<compile_context>
chip_gen: v5e
topology: v5e:2x2
jax: 0.10.0
libtpu: 0.0.40
codegen_flags: <defaults>
</compile_context>

<pallas_src>
import jax
import jax.numpy as jnp
from jax.experimental import pallas as pl
from jax.experimental.pallas import tpu as pltpu

num_inputs = 784
num_outputs = 10

LANES = 128      # pad N: 10 -> 128 (lane-dense output vregs, no vst.msk)
SUBLANES = 8     # batch tiles are a multiple of 8 sublanes
MAX_TB = 2048    # batch-tile cap (bf16 x tiles + f32 out tiles << 32 MiB VMEM)


def _linear_kernel(x_ref, wt_ref, b_ref, o_ref):
    # x_ref: (TB, 784) bf16, wt_ref: (784, 128) bf16, b_ref: (1, 128) f32,
    # o_ref: (TB, 128) f32. MXU matmul with f32 accumulation.
    acc = jnp.dot(x_ref[...], wt_ref[...], preferred_element_type=jnp.float32)
    o_ref[...] = (acc + b_ref[...]).astype(o_ref.dtype)


def prepare_params(weight, bias, compute_dtype=jnp.bfloat16):
    """One-time parameter prep: transpose + zero-pad to lane-dense layout.

    The *explicit* compute dtype of the kernel is `compute_dtype` (inputs are
    cast to it in linear_net_forward); accumulation is always f32.

    weight: (num_outputs, num_inputs) PyTorch convention -> (num_inputs, 128)
    bias:   (num_outputs,)                               -> (1, 128) f32
    """
    wt = (
        jnp.zeros((num_inputs, LANES), compute_dtype)
        .at[:, :num_outputs]
        .set(weight.T.astype(compute_dtype))
    )
    b = (
        jnp.zeros((1, LANES), jnp.float32)
        .at[:, :num_outputs]
        .set(bias.astype(jnp.float32))
    )
    return wt, b


def _round_up(n, m):
    return (n + m - 1) // m * m


def _pick_batch_tile(b):
    """Batch tile: multiple of 8; >=2 tiles once B >= 512 so v7x's 2 TCs both
    get work (neutral on v5e/v6e); capped at MAX_TB."""
    b8 = _round_up(max(b, 1), SUBLANES)
    if b8 < 512:
        return b8
    n_tiles = max(2, pl.cdiv(b8, MAX_TB))
    return _round_up(pl.cdiv(b8, n_tiles), SUBLANES)


@jax.jit
def linear_net_forward(x, wt_padded, b_padded):
    """Pallas implementation of LinearNet.forward.

    x:         (B, ...) with trailing dims flattening to num_inputs
    wt_padded: (num_inputs, 128)  from prepare_params (compute dtype, e.g. bf16)
    b_padded:  (1, 128) f32       from prepare_params
    returns    (B, num_outputs) f32
    """
    B = x.shape[0]
    x2d = x.reshape(B, -1)
    assert x2d.shape[1] == num_inputs, "flattened input must have 784 features"

    # Compute dtype is the one chosen explicitly in prepare_params. Ideally
    # this cast is fused upstream where x is produced (a standalone cast of a
    # huge x is itself an HBM pass); here it is tiny.
    x2d = x2d.astype(wt_padded.dtype)

    tb = _pick_batch_tile(B)
    grid = (pl.cdiv(B, tb),)   # boundary block clipped by Pallas -- no jnp.pad

    out_dtype = jnp.float32
    cost = pl.CostEstimate(
        flops=2 * B * num_inputs * LANES,
        transcendentals=0,
        bytes_accessed=(
            B * num_inputs * x2d.dtype.itemsize          # stream x
            + wt_padded.size * wt_padded.dtype.itemsize  # resident weight
            + b_padded.size * b_padded.dtype.itemsize    # resident bias
            + B * LANES * jnp.dtype(out_dtype).itemsize  # output writeback
        ),
    )

    out = pl.pallas_call(
        _linear_kernel,
        out_shape=jax.ShapeDtypeStruct((B, LANES), out_dtype),
        grid_spec=pltpu.PrefetchScalarGridSpec(
            num_scalar_prefetch=0,
            grid=grid,
            in_specs=[
                # x streams through the double-buffered pipeline.
                pl.BlockSpec((tb, num_inputs), lambda i: (i, 0)),
                # Weight / bias: constant block index -> fetched once, keep a
                # single VMEM buffer (no redundant second buffer).
                pl.BlockSpec(
                    (num_inputs, LANES),
                    lambda i: (0, 0),
                    pipeline_mode=pl.Buffered(1),
                ),
                pl.BlockSpec(
                    (1, LANES),
                    lambda i: (0, 0),
                    pipeline_mode=pl.Buffered(1),
                ),
            ],
            out_specs=pl.BlockSpec((tb, LANES), lambda i: (i, 0)),
        ),
        compiler_params=pltpu.CompilerParams(
            dimension_semantics=("parallel",),   # shards B-tiles on v7x's 2 TCs
            vmem_limit_bytes=32 * 1024 * 1024,
        ),
        cost_estimate=cost,
    )(x2d, wt_padded, b_padded)

    # Rows are already exactly B; only strip the lane padding (10 of 128).
    return out[:, :num_outputs]


if __name__ == "__main__":
    key = jax.random.PRNGKey(0)
    kx, kw, kb = jax.random.split(key, 3)

    B = 2
    # MNIST-like input: (B, 1, 28, 28) -> flattened to 784 inside forward.
    x = jax.random.normal(kx, (B, 1, 28, 28), dtype=jnp.float32)

    # nn.Linear-style parameters: weight (10, 784), bias (10,)
    bound = 1.0 / jnp.sqrt(num_inputs)
    weight = jax.random.uniform(
        kw, (num_outputs, num_inputs), minval=-bound, maxval=bound, dtype=jnp.float32
    )
    bias = jax.random.uniform(
        kb, (num_outputs,), minval=-bound, maxval=bound, dtype=jnp.float32
    )

    # One-time parameter preparation (transpose + lane padding, bf16 compute).
    wt_padded, b_padded = prepare_params(weight, bias)

    y = linear_net_forward(x, wt_padded, b_padded)
    jax.block_until_ready(y)

    # Sanity check against plain-JAX f32 reference (loosened tolerance since
    # inputs/weights are streamed in bf16 with f32 accumulation).
    y_ref = x.reshape(B, -1) @ weight.T + bias
    assert y.shape == (B, num_outputs)
    assert y.dtype == jnp.float32
    assert jnp.allclose(y, y_ref, atol=5e-2, rtol=5e-2)

    print("KERNEL_OK")
</pallas_src>

<mosaic_0001>
module attributes {stable_mosaic.version = 11 : i64} {
  func.func @_linear_kernel(%arg0: i32, %arg1: memref<8x784xbf16, #tpu.memory_space<vmem>>, %arg2: memref<784x128xbf16, #tpu.memory_space<vmem>>, %arg3: memref<1x128xf32, #tpu.memory_space<vmem>>, %arg4: memref<8x128xf32, #tpu.memory_space<vmem>>) attributes {dimension_semantics = [#tpu.dimension_semantics<parallel>], iteration_bounds = array<i64: 1>, scalar_prefetch = 0 : i64, scratch_operands = 0 : i64, tpu.core_type = #tpu.core_type<tc>, window_params = [{transform_indices = @transform_0, window_bounds = array<i64: 8, 784>}, {pipeline_mode = #tpu.pipeline_mode<synchronous>, transform_indices = @transform_1, window_bounds = array<i64: 784, 128>}, {pipeline_mode = #tpu.pipeline_mode<synchronous>, transform_indices = @transform_2, window_bounds = array<i64: 1, 128>}, {transform_indices = @transform_3, window_bounds = array<i64: 8, 128>}]} {
    %c0 = arith.constant 0 : index
    %c0_0 = arith.constant 0 : index
    %0 = vector.load %arg1[%c0, %c0_0] : memref<8x784xbf16, #tpu.memory_space<vmem>>, vector<8x784xbf16>
    %c0_1 = arith.constant 0 : index
    %c0_2 = arith.constant 0 : index
    %1 = vector.load %arg2[%c0_1, %c0_2] : memref<784x128xbf16, #tpu.memory_space<vmem>>, vector<784x128xbf16>
    %cst = arith.constant dense<0.000000e+00> : vector<8x128xf32>
    %2 = tpu.matmul %0, %1, %cst {dimension_numbers = #tpu.dot_dimension_numbers<[1], [0], [0], [1], [0, 0, 1, 1], [], []>} : vector<8x784xbf16>, vector<784x128xbf16>, vector<8x128xf32> -> vector<8x128xf32>
    %c0_3 = arith.constant 0 : index
    %c0_4 = arith.constant 0 : index
    %3 = vector.load %arg3[%c0_3, %c0_4] : memref<1x128xf32, #tpu.memory_space<vmem>>, vector<1x128xf32>
    %4 = vector.broadcast %3 : vector<1x128xf32> to vector<8x128xf32>
    %5 = arith.addf %2, %4 : vector<8x128xf32>
    %c0_5 = arith.constant 0 : index
    %c0_6 = arith.constant 0 : index
    %6 = vector.load %arg4[%c0_5, %c0_6] : memref<8x128xf32, #tpu.memory_space<vmem>>, vector<8x128xf32>
    tpu.vector_store %arg4[%c0_5, %c0_6], %5 {strides = array<i32>} : memref<8x128xf32, #tpu.memory_space<vmem>>, vector<8x128xf32>,
    return
  }
  func.func @transform_0(%arg0: i32) -> (i32, i32) {
    %c0_i32 = arith.constant 0 : i32
    %c0_i32_0 = arith.constant 0 : i32
    return %arg0, %c0_i32 : i32, i32
  }
  func.func @transform_1(%arg0: i32) -> (i32, i32) {
    %c0_i32 = arith.constant 0 : i32
    %c0_i32_0 = arith.constant 0 : i32
    %c0_i32_1 = arith.constant 0 : i32
    return %c0_i32, %c0_i32_0 : i32, i32
  }
  func.func @transform_2(%arg0: i32) -> (i32, i32) {
    %c0_i32 = arith.constant 0 : i32
    %c0_i32_0 = arith.constant 0 : i32
    %c0_i32_1 = arith.constant 0 : i32
    return %c0_i32, %c0_i32_0 : i32, i32
  }
  func.func @transform_3(%arg0: i32) -> (i32, i32) {
    %c0_i32 = arith.constant 0 : i32
    %c0_i32_0 = arith.constant 0 : i32
    return %arg0, %c0_i32 : i32, i32
  }
}

</mosaic_0001>

<bundles_post_ra>
// kernel: linear_net_forward.1
= control target key start
LH: loop header
LB: loop body
LE: loop exit
PB: predicated region body
PF: predicated region fallthrough
CT: control target
= control target key end

     0   :  { %8 = vsyncpa [#allocation3], 0  ;;  %s922_s0 = inlined_call_operand.vmem [shape: bf16[2,784], index: 0, kind: input, shape index: {}]   ;;  %s923_s1 = inlined_call_operand.hbm [shape: bf16[784,128], index: 1, kind: input, shape index: {}]   ;;  %s924_s2 = inlined_call_operand.vmem [shape: f32[1,128], index: 2, kind: input, shape index: {}]   ;;  %s925_s3 = inlined_call_operand.hbm [shape: f32[2,128], index: 3, kind: output, shape index: {}]  }
   0x1   :  { %9 = vsyncpa [#allocation4], 0  ;;  %s16_s14 = sshll.u32 %s923_s1, 4  ;;  %s875_s15 = smov [#allocation2]   ;;  %s17_s14 = int_to_ptr.hbm [resolvable:$true] %s16_s14 }
   0x2   :  { %s18_s16 = sshll.u32 %s875_s15, 4  ;;  %s876_s17 = smov 64   ;;  %s19_s16 = int_to_ptr.vmem [resolvable:$true] %s18_s16 }
   0x3   :  { %s877_s18 = smov 4  }
   0x4   :  { %24 = dma.hbm_to_vmem [thread:$0]  %s17_s14, 6272, %s19_s16, [#allocation3], %s876_s17, %s876_s17, %s877_s18  }
   0x5   :  { %871 = dma.done.wait [#allocation3], 6272  }
   0x6   :  { %872 = vsyncadd [#allocation3], 4294961024  ;;  %v774_v0 = vld [vmem:[#allocation2 + $0x38] sm:$0xff]  ;;  %v773_v3 = vld [vmem:[#allocation2 + $0x30] sm:$0xff]  ;;  %vm456_vm0 = vcmask 130048  }
   0x7   :  { %v782_v1 = vld [vmem:[#allocation2 + $0x78] sm:$0xff]  ;;  %459 = vmatpush.bf16.msra.mxu0 %v774_v0  ;;  %v781_v4 = vld [vmem:[#allocation2 + $0x70] sm:$0xff]  ;;  %v772_v8 = vld [vmem:[#allocation2 + $0x28] sm:$0xff] }
   0x8   :  { %v790_v2 = vld [vmem:[#allocation2 + $0xb8] sm:$0xff]  ;;  %472 = vmatpush.bf16.msra.mxu1 %v782_v1  ;;  %v789_v5 = vld [vmem:[#allocation2 + $0xb0] sm:$0xff]  ;;  %v780_v9 = vld [vmem:[#allocation2 + $0x68] sm:$0xff] }
   0x9   :  { %485 = vmatpush.bf16.msra.mxu2 %v790_v2  ;;  %v798_v6 = vld [vmem:[#allocation2 + $0xf8] sm:$0xff]  ;;  %v797_v7 = vld [vmem:[#allocation2 + $0xf0] sm:$0xff]  ;;  %v788_v10 = vld [vmem:[#allocation2 + $0xa8] sm:$0xff] }
   0xa   :  { %498 = vmatpush.bf16.msra.mxu3 %v798_v6  ;;  %v796_v11 = vld [vmem:[#allocation2 + $0xe8] sm:$0xff]  ;;  %v771_v12 = vld [vmem:[#allocation2 + $0x20] sm:$0xff]  ;;  %v32_v14 = vld [vmem:[%s922_s0] sm:$0x7f] }
   0xb   :  { %460 = vmatpush.bf16.msra.mxu0 %v773_v3  ;;  %v779_v13 = vld [vmem:[#allocation2 + $0x60] sm:$0xff]  ;;  %v35_v18 = vld [vmem:[%s922_s0 + $0x15] sm:$0x7f]  ;;  %139 = vst [vmem:[#allocation1] ss:$9 sm:$0xff] %v32_v14  ;;  %v770_v20 = vld [vmem:[#allocation2 + $0x18] sm:$0xff] }
   0xc   :  { %473 = vmatpush.bf16.msra.mxu1 %v781_v4  ;;  %v787_v15 = vld [vmem:[#allocation2 + $0xa0] sm:$0xff]  ;;  %v778_v21 = vld [vmem:[#allocation2 + $0x58] sm:$0xff]  ;;  %148 = vst [vmem:[#allocation1 + $0x3] ss:$9 sm:$0xff] %v35_v18  ;;  %v769_v24 = vld [vmem:[#allocation2 + $0x10] sm:$0xff] }
   0xd   :  { %486 = vmatpush.bf16.msra.mxu2 %v789_v5  ;;  %v33_v16 = vld [vmem:[%s922_s0 + $0x7] sm:$0x7f]  ;;  %v34_v17 = vld [vmem:[%s922_s0 + $0xe] sm:$0x7f]  ;;  %v777_v25 = vld [vmem:[#allocation2 + $0x50] sm:$0xff] }
   0xe   :  { %499 = vmatpush.bf16.msra.mxu3 %v797_v7  ;;  %v795_v19 = vld [vmem:[#allocation2 + $0xe0] sm:$0xff]  ;;  %142 = vst [vmem:[#allocation1 + $0x1] ss:$9 sm:$0xff] %v33_v16  ;;  %v786_v22 = vld [vmem:[#allocation2 + $0x98] sm:$0xff]  ;;  %v785_v26 = vld [vmem:[#allocation2 + $0x90] sm:$0xff] }
   0xf   :  { %461 = vmatpush.bf16.msra.mxu0 %v772_v8  ;;  %145 = vst [vmem:[#allocation1 + $0x2] ss:$9 sm:$0xff] %v34_v17  ;;  %v794_v23 = vld [vmem:[#allocation2 + $0xd8] sm:$0xff]  ;;  %v793_v27 = vld [vmem:[#allocation2 + $0xd0] sm:$0xff]  ;;  %v768_v28 = vld [vmem:[#allocation2 + $0x8] sm:$0xff] }
  0x10   :  { %474 = vmatpush.bf16.msra.mxu1 %v780_v9  ;;  %v776_v29 = vld [vmem:[#allocation2 + $0x48] sm:$0xff]  ;;  %v767_v32 = vld [vmem:[#allocation2] sm:$0xff]  ;;  %v806_v35 = vld [vmem:[#allocation2 + $0x138] sm:$0xff] }
  0x11   :  { %487 = vmatpush.bf16.msra.mxu2 %v788_v10  ;;  %v784_v30 = vld [vmem:[#allocation2 + $0x88] sm:$0xff]  ;;  %v775_v33 = vld [vmem:[#allocation2 + $0x40] sm:$0xff]  ;;  %v814_v36 = vld [vmem:[#allocation2 + $0x178] sm:$0xff] }
  0x12   :  { %500 = vmatpush.bf16.msra.mxu3 %v796_v11  ;;  %v792_v31 = vld [vmem:[#allocation2 + $0xc8] sm:$0xff]  ;;  %v783_v34 = vld [vmem:[#allocation2 + $0x80] sm:$0xff]  ;;  %v805_v42 = vld [vmem:[#allocation2 + $0x130] sm:$0xff] }
  0x13   :  { %462 = vmatpush.bf16.msra.mxu0 %v771_v12  ;;  %v815_v37 = vld [vmem:[#allocation2 + $0x180] sm:$0xff]  ;;  %v813_v43 = vld [vmem:[#allocation2 + $0x170] sm:$0xff]  ;;  %v804_v45 = vld [vmem:[#allocation2 + $0x128] sm:$0xff] }
  0x14   :  { %475 = vmatpush.bf16.msra.mxu1 %v779_v13  ;;  %v791_v40 = vld [vmem:[#allocation2 + $0xc0] sm:$0xff]  ;;  %v812_v46 = vld [vmem:[#allocation2 + $0x168] sm:$0xff]  ;;  %v802_v49 = vld [vmem:[#allocation2 + $0x118] sm:$0xff] }
  0x15   :  { %488 = vmatpush.bf16.msra.mxu2 %v787_v15  ;;  %v803_v47 = vld [vmem:[#allocation2 + $0x120] sm:$0xff]  ;;  %v810_v50 = vld [vmem:[#allocation2 + $0x158] sm:$0xff]  ;;  %v801_v52 = vld [vmem:[#allocation2 + $0x110] sm:$0xff] }
  0x16   :  { %501 = vmatpush.bf16.msra.mxu3 %v795_v19  ;;  %v149_v38 = vld [vmem:[#allocation1] sm:$0xff]  ;;  %v150_v39 = vld [vmem:[#allocation1 + $0x9] sm:$0xff]  ;;  %v151_v41 = vld [vmem:[#allocation1 + $0x12] sm:$0xff] }
  0x17   :  { %463 = vmatpush.bf16.msra.mxu0 %v770_v20  ;;  %v152_v44 = vld [vmem:[#allocation1 + $0x1b] sm:$0xff]  ;;  %v811_v48 = vld [vmem:[#allocation2 + $0x160] sm:$0xff]  ;;  %v800_v54 = vld [vmem:[#allocation2 + $0x108] sm:$0xff] }
  0x18   :  { %476 = vmatpush.bf16.msra.mxu1 %v778_v21  ;;  %v155_v51 = vld [vmem:[#allocation1 + $0x36] sm:$0xff]  ;;  %v799_v56 = vld [vmem:[#allocation2 + $0x100] sm:$0xff]  ;;  %v822_v2 = vld [vmem:[%s924_s2] ss:$0 sm:$0xff] }
  0x19   :  { %489 = vmatpush.bf16.msra.mxu2 %v786_v22  ;;  %v809_v53 = vld [vmem:[#allocation2 + $0x150] sm:$0xff]  ;;  %v808_v55 = vld [vmem:[#allocation2 + $0x148] sm:$0xff]  ;;  %v807_v57 = vld [vmem:[#allocation2 + $0x140] sm:$0xff] }
  0x1a   :  { %502 = vmatpush.bf16.msra.mxu3 %v794_v23  ;;  %v153_v58 = vld [vmem:[#allocation1 + $0x24] sm:$0xff]  ;;  %v154_v59 = vld [vmem:[#allocation1 + $0x2d] sm:$0xff] }
  0x1b   :  { %464 = vmatpush.bf16.msra.mxu0 %v769_v24 }
  0x1c   :  { %477 = vmatpush.bf16.msra.mxu1 %v777_v25 }
  0x1d   :  { %490 = vmatpush.bf16.msra.mxu2 %v785_v26 }
  0x1e   :  { %503 = vmatpush.bf16.msra.mxu3 %v793_v27 }
  0x1f   :  { %465 = vmatpush.bf16.msra.mxu0 %v768_v28 }
  0x20   :  { %478 = vmatpush.bf16.msra.mxu1 %v776_v29 }
  0x21   :  { %491 = vmatpush.bf16.msra.mxu2 %v784_v30 }
  0x22   :  { %504 = vmatpush.bf16.msra.mxu3 %v792_v31 }
  0x23   :  { %466 = vmatpush.bf16.msra.mxu0 %v767_v32 }
  0x24   :  { %479 = vmatpush.bf16.msra.mxu1 %v775_v33 }
  0x25   :  { %492 = vmatpush.bf16.msra.mxu2 %v783_v34 }
  0x26   :  { %467 = vmatmul.bf16.vlgmr.msra.gmra.mxu0 %v149_v38  ;;  %505 = vmatpush.bf16.msra.mxu3 %v791_v40 }
  0x27   :  { %511 = vmatpush.bf16.msrb.mxu0 %v806_v35  ;;  %480 = vmatmul.bf16.vlgmr.msra.gmra.mxu1 %v150_v39 }
  0x28   :  { %524 = vmatpush.bf16.msrb.mxu1 %v814_v36  ;;  %493 = vmatmul.bf16.vlgmr.msra.gmra.mxu2 %v151_v41 }
  0x29   :  { %544 = vmatpush.bf16.msrb.mxu2 %v815_v37  ;;  %506 = vmatmul.bf16.vlgmr.msra.gmra.mxu3 %v152_v44 }
  0x2b   :  { %512 = vmatpush.bf16.msrb.mxu0 %v805_v42 }
  0x2c   :  { %525 = vmatpush.bf16.msrb.mxu1 %v813_v43 }
  0x2f   :  { %513 = vmatpush.bf16.msrb.mxu0 %v804_v45 }
  0x30   :  { %526 = vmatpush.bf16.msrb.mxu1 %v812_v46 }
  0x33   :  { %514 = vmatpush.bf16.msrb.mxu0 %v803_v47 }
  0x34   :  { %527 = vmatpush.bf16.msrb.mxu1 %v811_v48 }
  0x37   :  { %515 = vmatpush.bf16.msrb.mxu0 %v802_v49 }
  0x38   :  { %528 = vmatpush.bf16.msrb.mxu1 %v810_v50  ;;  %766 = vmatmul.msk.bf16.vlgmr.msrb.gmra.mxu2 %vm456_vm0, %v155_v51 }
  0x3b   :  { %516 = vmatpush.bf16.msrb.mxu0 %v801_v52 }
  0x3c   :  { %529 = vmatpush.bf16.msrb.mxu1 %v809_v53 }
  0x3f   :  { %517 = vmatpush.bf16.msrb.mxu0 %v800_v54 }
  0x40   :  { %530 = vmatpush.bf16.msrb.mxu1 %v808_v55 }
  0x43   :  { %518 = vmatpush.bf16.msrb.mxu0 %v799_v56 }
  0x44   :  { %531 = vmatpush.bf16.msrb.mxu1 %v807_v57 }
  0x46   :  { %519 = vmatmul.bf16.vlgmr.msrb.gmra.mxu0 %v153_v58 }
  0x47   :  { %532 = vmatmul.bf16.vlgmr.msrb.gmra.mxu1 %v154_v59 }
  0xa3   :  { %v468_v60 = vpop.f32.mrf.mxu0 }
  0xa4   :  { %v481_v61 = vpop.f32.mrf.mxu1  ;;  %v469_v4 = vadd.f32 %v822_v2, %v468_v60 }
  0xa6   :  { %v482_v6 = vadd.f32 %v481_v61, %v469_v4 }
  0xab   :  { %v494_v62 = vpop.f32.mrf.mxu2  ;;  %v470_v63 = vpop.f32.mrf.mxu0 }
  0xac   :  { %v483_v0 = vpop.f32.mrf.mxu1  ;;  %v507_v1 = vpop.f32.mrf.mxu3  ;;  %v495_v8 = vadd.f32 %v494_v62, %v482_v6 }
  0xae   :  { %v508_v9 = vadd.f32 %v507_v1, %v495_v8 }
  0xb3   :  { %v496_v3 = vpop.f32.mrf.mxu2 }
  0xb4   :  { %v509_v5 = vpop.f32.mrf.mxu3 }
  0xbb   :  { %v546_v7 = vpop.f32.mrf.mxu2 }
  0xc3   :  { %v520_v10 = vpop.f32.mrf.mxu0  ;;  %v548_v13 = vpop.f32.mrf.mxu2 }
  0xc4   :  { %v521_v11 = vadd.f32 %v520_v10, %v508_v9  ;;  %v533_v12 = vpop.f32.mrf.mxu1 }
  0xc6   :  { %v534_v14 = vadd.f32 %v533_v12, %v521_v11 }
  0xc8   :  { %v547_v15 = vadd.f32 %v546_v7, %v534_v14 }
  0xca   :  { %550 = vst [vmem:[#allocation5] sm:$0xff] %v547_v15 }
  0xcb   :  { %v522_v16 = vpop.f32.mrf.mxu0 }
  0xcc   :  { %v535_v17 = vpop.f32.mrf.mxu1 }
  0xcd   :  { %554 = vsyncadd [#allocation4], 96  ;;  %s557_s2 = sshll.u32 %s925_s3, 4  ;;  %s878_s29 = smov [#allocation5]   ;;  %s558_s2 = int_to_ptr.hbm [resolvable:$true] %s557_s2 }
  0xce   :  { %s555_s30 = sshll.u32 %s878_s29, 4  ;;  %s879_s4 = smov 32   ;;  %s556_s30 = int_to_ptr.vmem [resolvable:$true] %s555_s30 }
  0xcf   :  { %s880_s5 = smov 2  }
  0xd0   :  { %563 = dma.vmem_to_hbm [thread:$0]  %s556_s30, 32, %s558_s2, [#allocation4], %s879_s4, %s879_s4, %s880_s5  }
  0xd1   :  { %873 = dma.done.wait [#allocation4], 128  }
  0xd2   :  { %874 = vsyncadd [#allocation4], 4294967168 }
  0xd3   :  { %568 = vsyncpa [#allocation3], 1 }
  0xd4   :  { %569 = vsyncpa [#allocation4], 1 }

</bundles_post_ra>
